<compile_context>
chip_gen: v7x
topology: tpu7x:2x2x1
jax: 0.10.0
libtpu: 0.0.40
codegen_flags: <defaults>
</compile_context>

<pallas_src>
import functools

import jax
import jax.numpy as jnp
import numpy as np
from jax import lax
from jax.experimental import pallas as pl
from jax.experimental.pallas import tpu as pltpu

# ----- constants (stand-in for the `constant` module) -----
GRID_H = 8
GRID_W = 8
IMG_W = 128
IMG_H = 128
MIN_H = IMG_W / GRID_H / 8.0   # matches: min_h = img_W / grid_h / 8
MIN_W = IMG_H / GRID_W / 8.0   # matches: min_w = img_H / grid_w / 8

L_NUM = 1  # 1 -> L1Loss, 2 -> MSELoss

LANES = 128
SUBLANES = 8
NSPLIT = 2          # leading "parallel" grid axis (both TCs on v7x)
TR_TARGET = 1024    # rows per streaming tile


def _cdiv(a, b):
    return -(-a // b)


def _round_up(x, m):
    return _cdiv(x, m) * m


# ============================================================
# Fused kernel: photometric partial sums + mesh losses (epilogue)
# ============================================================
def _fused_loss_kernel(mx_ref, my_ref, img_ref, w1_ref, w2_ref, w3_ref,
                       m1_ref, m2_ref, m3_ref, out_ref, acc_ref, *, l_num):
    # --- all grid-position reads hoisted to kernel top level (never inside
    #     a pl.when closure: program_id has no lowering inside cond branches
    #     on the interpret fallback path) ---
    p = pl.program_id(0)
    i = pl.program_id(1)
    last_i = pl.num_programs(1) - 1
    gate = jnp.where(p == 0, 1.0, 0.0).astype(jnp.float32)

    @pl.when(i == 0)
    def _():
        acc_ref[...] = jnp.zeros_like(acc_ref)

    img = img_ref[...].astype(jnp.float32)

    def reduce_term(w_ref, m_ref):
        d = w_ref[...].astype(jnp.float32) - img * m_ref[...].astype(jnp.float32)
        d = d * d if l_num == 2 else jnp.abs(d)
        # (1, TR, 128) -> (TR//8, 8, 128) is tile-aligned; sum is pure VPU adds.
        return d.reshape(-1, SUBLANES, LANES).sum(axis=0)

    acc_ref[0, :, :] += reduce_term(w1_ref, m1_ref)
    acc_ref[1, :, :] += reduce_term(w2_ref, m2_ref)
    acc_ref[2, :, :] += reduce_term(w3_ref, m3_ref)

    @pl.when(i == last_i)
    def _():
        # --- single cross-lane reduction per stream (epilogue only) ---
        s1 = jnp.sum(acc_ref[0, :, :])
        s2 = jnp.sum(acc_ref[1, :, :])
        s3 = jnp.sum(acc_ref[2, :, :])

        # --- mesh losses (tiny; gated so only the p==0 slice contributes) ---
        gh, gw = GRID_H, GRID_W
        x = mx_ref[...].astype(jnp.float32)   # (B, gh+1, gw+1)
        y = my_ref[...].astype(jnp.float32)

        # inter_grid_loss
        wex = x[:, :, 0:gw] - x[:, :, 1:gw + 1]           # (B, gh+1, gw)
        wey = y[:, :, 0:gw] - y[:, :, 1:gw + 1]
        dot_w = (wex[:, :, 0:gw - 1] * wex[:, :, 1:gw]
                 + wey[:, :, 0:gw - 1] * wey[:, :, 1:gw])
        nw1 = wex[:, :, 0:gw - 1] ** 2 + wey[:, :, 0:gw - 1] ** 2
        nw2 = wex[:, :, 1:gw] ** 2 + wey[:, :, 1:gw] ** 2
        cos_w = dot_w * lax.rsqrt(nw1 * nw2)

        hex_ = x[:, 0:gh, :] - x[:, 1:gh + 1, :]          # (B, gh, gw+1)
        hey = y[:, 0:gh, :] - y[:, 1:gh + 1, :]
        dot_h = (hex_[:, 0:gh - 1, :] * hex_[:, 1:gh, :]
                 + hey[:, 0:gh - 1, :] * hey[:, 1:gh, :])
        nh1 = hex_[:, 0:gh - 1, :] ** 2 + hey[:, 0:gh - 1, :] ** 2
        nh2 = hex_[:, 1:gh, :] ** 2 + hey[:, 1:gh, :] ** 2
        cos_h = dot_h * lax.rsqrt(nh1 * nh2)

        inter = jnp.mean(1.0 - cos_w) + jnp.mean(1.0 - cos_h)

        # intra_grid_loss (delta_x == wex, delta_y == hey)
        intra = (jnp.mean(jnp.maximum(wex + MIN_W, 0.0))
                 + jnp.mean(jnp.maximum(hey + MIN_H, 0.0)))

        # pack the 5 scalars onto distinct sublanes of a lane-dense tile
        sub = lax.broadcasted_iota(jnp.int32, (SUBLANES, LANES), 0)
        tile = (jnp.where(sub == 0, s1, 0.0)
                + jnp.where(sub == 1, s2, 0.0)
                + jnp.where(sub == 2, s3, 0.0)
                + jnp.where(sub == 3, inter * gate, 0.0)
                + jnp.where(sub == 4, intra * gate, 0.0))
        out_ref[...] = tile.reshape(1, SUBLANES, LANES)


# ============================================================
# Module forward (wrapper)
# ============================================================
@functools.partial(jax.jit, static_argnames=("l_num",))
def homo_mesh_total_loss(mesh, img1, train_warp2_H1, train_warp2_H2,
                         train_warp2_H3, train_one_warp_H1, train_one_warp_H2,
                         train_one_warp_H3, l_num=L_NUM):
    total = img1.size
    R = _cdiv(total, LANES)
    R_per = _cdiv(R, NSPLIT)
    TR = min(TR_TARGET, _round_up(R_per, SUBLANES))
    R_per_pad = _round_up(R_per, TR)
    n_inner = R_per_pad // TR
    padded_total = NSPLIT * R_per_pad * LANES

    def prep(x):
        flat = x.reshape(-1)                 # native dtype, no extra cast pass
        pad = padded_total - total
        if pad:
            flat = jnp.pad(flat, (0, pad))   # zeros contribute 0 to L1/L2 sums
        return flat.reshape(NSPLIT, R_per_pad, LANES)

    tiles = [prep(t) for t in (img1, train_warp2_H1, train_warp2_H2,
                               train_warp2_H3, train_one_warp_H1,
                               train_one_warp_H2, train_one_warp_H3)]

    B = mesh.shape[0]
    mesh_x = mesh[..., 0].astype(jnp.float32)
    mesh_y = mesh[..., 1].astype(jnp.float32)

    mesh_spec = pl.BlockSpec((B, GRID_H + 1, GRID_W + 1), lambda p, i: (0, 0, 0))
    tile_spec = pl.BlockSpec((1, TR, LANES), lambda p, i: (p, i, 0))
    out_spec = pl.BlockSpec((1, SUBLANES, LANES), lambda p, i: (p, 0, 0))

    out = pl.pallas_call(
        functools.partial(_fused_loss_kernel, l_num=l_num),
        out_shape=jax.ShapeDtypeStruct((NSPLIT, SUBLANES, LANES), jnp.float32),
        grid=(NSPLIT, n_inner),
        in_specs=[mesh_spec, mesh_spec] + [tile_spec] * 7,
        out_specs=out_spec,
        scratch_shapes=[pltpu.VMEM((3, SUBLANES, LANES), jnp.float32)],
        compiler_params=pltpu.CompilerParams(
            dimension_semantics=("parallel", "arbitrary")),
    )(mesh_x, mesh_y, *tiles)

    # scalars live at lane 0 of sublanes 0..4; sum the per-core partials
    sums = jnp.sum(out[:, :, 0], axis=0)     # (8,)
    inv_n = 1.0 / float(total)
    loss1 = sums[0] * inv_n
    loss2 = sums[1] * inv_n
    loss3 = sums[2] * inv_n
    inter_loss = sums[3]
    intra_loss = sums[4]

    mesh_loss = 16.0 * inter_loss + 16.0 * intra_loss
    loss_lp = 1.0 * loss1 + 4.0 * loss2 + 16.0 * loss3
    total_loss = loss_lp + mesh_loss
    return total_loss, loss_lp, mesh_loss


# ============================================================
# Pure-JAX reference (sanity check)
# ============================================================
def _ref_forward(mesh, img1, w1, w2, w3, m1, m2, m3, l_num=L_NUM):
    gh, gw = GRID_H, GRID_W

    def base_loss(a, b):
        d = a - b
        return jnp.mean(d * d) if l_num == 2 else jnp.mean(jnp.abs(d))

    def inter(m):
        we = m[:, :, 0:gw, :] - m[:, :, 1:gw + 1, :]
        cos_w = jnp.sum(we[:, :, 0:gw - 1, :] * we[:, :, 1:gw, :], 3) / (
            jnp.sqrt(jnp.sum(we[:, :, 0:gw - 1, :] ** 2, 3))
            * jnp.sqrt(jnp.sum(we[:, :, 1:gw, :] ** 2, 3)))
        he = m[:, 0:gh, :, :] - m[:, 1:gh + 1, :, :]
        cos_h = jnp.sum(he[:, 0:gh - 1, :, :] * he[:, 1:gh, :, :], 3) / (
            jnp.sqrt(jnp.sum(he[:, 0:gh - 1, :, :] ** 2, 3))
            * jnp.sqrt(jnp.sum(he[:, 1:gh, :, :] ** 2, 3)))
        return jnp.mean(1.0 - cos_w) + jnp.mean(1.0 - cos_h)

    def intra(p):
        dx = p[:, :, 0:gw, 0] - p[:, :, 1:gw + 1, 0]
        dy = p[:, 0:gh, :, 1] - p[:, 1:gh + 1, :, 1]
        return (jnp.mean(jax.nn.relu(dx + MIN_W))
                + jnp.mean(jax.nn.relu(dy + MIN_H)))

    loss1 = base_loss(w1, img1 * m1)
    loss2 = base_loss(w2, img1 * m2)
    loss3 = base_loss(w3, img1 * m3)
    mesh_loss = 16.0 * inter(mesh) + 16.0 * intra(mesh)
    loss_lp = 1.0 * loss1 + 4.0 * loss2 + 16.0 * loss3
    return loss_lp + mesh_loss, loss_lp, mesh_loss


# ============================================================
if __name__ == "__main__":
    key = jax.random.PRNGKey(0)
    ks = jax.random.split(key, 8)

    B, C, H, W = 2, 4, 16, 16  # small image shapes (NCHW)

    # Mesh: regular grid covering the image + small perturbation.
    xs = jnp.linspace(0.0, float(IMG_W), GRID_W + 1)
    ys = jnp.linspace(0.0, float(IMG_H), GRID_H + 1)
    base = jnp.stack(jnp.meshgrid(xs, ys, indexing="xy"), axis=-1)  # (gh+1, gw+1, 2)
    base = jnp.broadcast_to(base, (B, GRID_H + 1, GRID_W + 1, 2))
    mesh = base + 2.0 * jax.random.normal(ks[0], base.shape, dtype=jnp.float32)

    img1 = jax.random.uniform(ks[1], (B, C, H, W), dtype=jnp.float32)
    w1 = jax.random.uniform(ks[2], (B, C, H, W), dtype=jnp.float32)
    w2 = jax.random.uniform(ks[3], (B, C, H, W), dtype=jnp.float32)
    w3 = jax.random.uniform(ks[4], (B, C, H, W), dtype=jnp.float32)
    m1 = jax.random.uniform(ks[5], (B, C, H, W), dtype=jnp.float32)
    m2 = jax.random.uniform(ks[6], (B, C, H, W), dtype=jnp.float32)
    m3 = jax.random.uniform(ks[7], (B, C, H, W), dtype=jnp.float32)

    total, loss_lp, mesh_loss = homo_mesh_total_loss(
        mesh, img1, w1, w2, w3, m1, m2, m3, l_num=L_NUM)
    jax.block_until_ready((total, loss_lp, mesh_loss))

    ref_total, ref_lp, ref_mesh = _ref_forward(
        mesh, img1, w1, w2, w3, m1, m2, m3, l_num=L_NUM)
    np.testing.assert_allclose(np.asarray(total), np.asarray(ref_total),
                               rtol=1e-4, atol=1e-4)
    np.testing.assert_allclose(np.asarray(loss_lp), np.asarray(ref_lp),
                               rtol=1e-4, atol=1e-4)
    np.testing.assert_allclose(np.asarray(mesh_loss), np.asarray(ref_mesh),
                               rtol=1e-4, atol=1e-4)

    print("KERNEL_OK")
</pallas_src>

<mosaic_0001>
module attributes {stable_mosaic.version = 11 : i64} {
  func.func @_fused_loss_kernel(%arg0: i32, %arg1: i32, %arg2: memref<2x9x9xf32, #tpu.memory_space<vmem>>, %arg3: memref<2x9x9xf32, #tpu.memory_space<vmem>>, %arg4: memref<1x8x128xf32, #tpu.memory_space<vmem>>, %arg5: memref<1x8x128xf32, #tpu.memory_space<vmem>>, %arg6: memref<1x8x128xf32, #tpu.memory_space<vmem>>, %arg7: memref<1x8x128xf32, #tpu.memory_space<vmem>>, %arg8: memref<1x8x128xf32, #tpu.memory_space<vmem>>, %arg9: memref<1x8x128xf32, #tpu.memory_space<vmem>>, %arg10: memref<1x8x128xf32, #tpu.memory_space<vmem>>, %arg11: memref<1x8x128xf32, #tpu.memory_space<vmem>>, %arg12: memref<3x8x128xf32, #tpu.memory_space<vmem>>) attributes {dimension_semantics = [#tpu.dimension_semantics<parallel>, #tpu.dimension_semantics<arbitrary>], iteration_bounds = array<i64: 2, 1>, scalar_prefetch = 0 : i64, scratch_operands = 1 : i64, tpu.core_type = #tpu.core_type<tc>, window_params = [{pipeline_mode = #tpu.pipeline_mode<synchronous>, transform_indices = @transform_0, window_bounds = array<i64: 2, 9, 9>}, {pipeline_mode = #tpu.pipeline_mode<synchronous>, transform_indices = @transform_1, window_bounds = array<i64: 2, 9, 9>}, {transform_indices = @transform_2, window_bounds = array<i64: 1, 8, 128>}, {transform_indices = @transform_3, window_bounds = array<i64: 1, 8, 128>}, {transform_indices = @transform_4, window_bounds = array<i64: 1, 8, 128>}, {transform_indices = @transform_5, window_bounds = array<i64: 1, 8, 128>}, {transform_indices = @transform_6, window_bounds = array<i64: 1, 8, 128>}, {transform_indices = @transform_7, window_bounds = array<i64: 1, 8, 128>}, {transform_indices = @transform_8, window_bounds = array<i64: 1, 8, 128>}, {transform_indices = @transform_9, window_bounds = array<i64: 1, 8, 128>}]} {
    %c0_i32 = arith.constant 0 : i32
    %0 = arith.cmpi eq, %arg0, %c0_i32 : i32
    %cst = arith.constant 1.000000e+00 : f32
    %cst_0 = arith.constant 0.000000e+00 : f32
    %1 = arith.select %0, %cst, %cst_0 : f32
    %c0_i32_1 = arith.constant 0 : i32
    %2 = arith.cmpi eq, %arg1, %c0_i32_1 : i32
    %3 = arith.extui %2 : i1 to i32
    %c0_i32_2 = arith.constant 0 : i32
    %4 = arith.cmpi ne, %3, %c0_i32_2 : i32
    scf.if %4 {
      %cst_44 = arith.constant 0.000000e+00 : f32
      %45 = vector.broadcast %cst_44 : f32 to vector<3x8x128xf32>
      %c0_45 = arith.constant 0 : index
      %c0_46 = arith.constant 0 : index
      %c0_47 = arith.constant 0 : index
      %46 = vector.load %arg12[%c0_45, %c0_46, %c0_47] : memref<3x8x128xf32, #tpu.memory_space<vmem>>, vector<3x8x128xf32>
      tpu.vector_store %arg12[%c0_45, %c0_46, %c0_47], %45 {strides = array<i32>} : memref<3x8x128xf32, #tpu.memory_space<vmem>>, vector<3x8x128xf32>,
    } else {
    }
    %c0 = arith.constant 0 : index
    %c0_3 = arith.constant 0 : index
    %c0_4 = arith.constant 0 : index
    %5 = vector.load %arg4[%c0, %c0_3, %c0_4] : memref<1x8x128xf32, #tpu.memory_space<vmem>>, vector<1x8x128xf32>
    %c0_5 = arith.constant 0 : index
    %c0_6 = arith.constant 0 : index
    %c0_7 = arith.constant 0 : index
    %6 = vector.load %arg12[%c0_5, %c0_6, %c0_7] : memref<3x8x128xf32, #tpu.memory_space<vmem>>, vector<1x8x128xf32>
    %7 = vector.shape_cast %6 : vector<1x8x128xf32> to vector<8x128xf32>
    %c0_8 = arith.constant 0 : index
    %c0_9 = arith.constant 0 : index
    %c0_10 = arith.constant 0 : index
    %8 = vector.load %arg5[%c0_8, %c0_9, %c0_10] : memref<1x8x128xf32, #tpu.memory_space<vmem>>, vector<1x8x128xf32>
    %c0_11 = arith.constant 0 : index
    %c0_12 = arith.constant 0 : index
    %c0_13 = arith.constant 0 : index
    %9 = vector.load %arg8[%c0_11, %c0_12, %c0_13] : memref<1x8x128xf32, #tpu.memory_space<vmem>>, vector<1x8x128xf32>
    %10 = arith.mulf %5, %9 : vector<1x8x128xf32>
    %11 = arith.subf %8, %10 : vector<1x8x128xf32>
    %12 = math.absf %11 : vector<1x8x128xf32>
    %cst_14 = arith.constant dense<0.000000e+00> : vector<8x128xf32>
    %13 = vector.multi_reduction <add>, %12, %cst_14 [0] : vector<1x8x128xf32> to vector<8x128xf32>
    %14 = arith.addf %7, %13 : vector<8x128xf32>
    %c0_15 = arith.constant 0 : index
    %c0_16 = arith.constant 0 : index
    %c0_17 = arith.constant 0 : index
    %15 = vector.load %arg12[%c0_15, %c0_16, %c0_17] : memref<3x8x128xf32, #tpu.memory_space<vmem>>, vector<1x8x128xf32>
    %16 = vector.shape_cast %15 : vector<1x8x128xf32> to vector<8x128xf32>
    %17 = vector.shape_cast %14 : vector<8x128xf32> to vector<1x8x128xf32>
    tpu.vector_store %arg12[%c0_15, %c0_16, %c0_17], %17 {strides = array<i32>} : memref<3x8x128xf32, #tpu.memory_space<vmem>>, vector<1x8x128xf32>,
    %c1 = arith.constant 1 : index
    %c0_18 = arith.constant 0 : index
    %c0_19 = arith.constant 0 : index
    %18 = vector.load %arg12[%c1, %c0_18, %c0_19] : memref<3x8x128xf32, #tpu.memory_space<vmem>>, vector<1x8x128xf32>
    %19 = vector.shape_cast %18 : vector<1x8x128xf32> to vector<8x128xf32>
    %c0_20 = arith.constant 0 : index
    %c0_21 = arith.constant 0 : index
    %c0_22 = arith.constant 0 : index
    %20 = vector.load %arg6[%c0_20, %c0_21, %c0_22] : memref<1x8x128xf32, #tpu.memory_space<vmem>>, vector<1x8x128xf32>
    %c0_23 = arith.constant 0 : index
    %c0_24 = arith.constant 0 : index
    %c0_25 = arith.constant 0 : index
    %21 = vector.load %arg9[%c0_23, %c0_24, %c0_25] : memref<1x8x128xf32, #tpu.memory_space<vmem>>, vector<1x8x128xf32>
    %22 = arith.mulf %5, %21 : vector<1x8x128xf32>
    %23 = arith.subf %20, %22 : vector<1x8x128xf32>
    %24 = math.absf %23 : vector<1x8x128xf32>
    %cst_26 = arith.constant dense<0.000000e+00> : vector<8x128xf32>
    %25 = vector.multi_reduction <add>, %24, %cst_26 [0] : vector<1x8x128xf32> to vector<8x128xf32>
    %26 = arith.addf %19, %25 : vector<8x128xf32>
    %c1_27 = arith.constant 1 : index
    %c0_28 = arith.constant 0 : index
    %c0_29 = arith.constant 0 : index
    %27 = vector.load %arg12[%c1_27, %c0_28, %c0_29] : memref<3x8x128xf32, #tpu.memory_space<vmem>>, vector<1x8x128xf32>
    %28 = vector.shape_cast %27 : vector<1x8x128xf32> to vector<8x128xf32>
    %29 = vector.shape_cast %26 : vector<8x128xf32> to vector<1x8x128xf32>
    tpu.vector_store %arg12[%c1_27, %c0_28, %c0_29], %29 {strides = array<i32>} : memref<3x8x128xf32, #tpu.memory_space<vmem>>, vector<1x8x128xf32>,
    %c2 = arith.constant 2 : index
    %c0_30 = arith.constant 0 : index
    %c0_31 = arith.constant 0 : index
    %30 = vector.load %arg12[%c2, %c0_30, %c0_31] : memref<3x8x128xf32, #tpu.memory_space<vmem>>, vector<1x8x128xf32>
    %31 = vector.shape_cast %30 : vector<1x8x128xf32> to vector<8x128xf32>
    %c0_32 = arith.constant 0 : index
    %c0_33 = arith.constant 0 : index
    %c0_34 = arith.constant 0 : index
    %32 = vector.load %arg7[%c0_32, %c0_33, %c0_34] : memref<1x8x128xf32, #tpu.memory_space<vmem>>, vector<1x8x128xf32>
    %c0_35 = arith.constant 0 : index
    %c0_36 = arith.constant 0 : index
    %c0_37 = arith.constant 0 : index
    %33 = vector.load %arg10[%c0_35, %c0_36, %c0_37] : memref<1x8x128xf32, #tpu.memory_space<vmem>>, vector<1x8x128xf32>
    %34 = arith.mulf %5, %33 : vector<1x8x128xf32>
    %35 = arith.subf %32, %34 : vector<1x8x128xf32>
    %36 = math.absf %35 : vector<1x8x128xf32>
    %cst_38 = arith.constant dense<0.000000e+00> : vector<8x128xf32>
    %37 = vector.multi_reduction <add>, %36, %cst_38 [0] : vector<1x8x128xf32> to vector<8x128xf32>
    %38 = arith.addf %31, %37 : vector<8x128xf32>
    %c2_39 = arith.constant 2 : index
    %c0_40 = arith.constant 0 : index
    %c0_41 = arith.constant 0 : index
    %39 = vector.load %arg12[%c2_39, %c0_40, %c0_41] : memref<3x8x128xf32, #tpu.memory_space<vmem>>, vector<1x8x128xf32>
    %40 = vector.shape_cast %39 : vector<1x8x128xf32> to vector<8x128xf32>
    %41 = vector.shape_cast %38 : vector<8x128xf32> to vector<1x8x128xf32>
    tpu.vector_store %arg12[%c2_39, %c0_40, %c0_41], %41 {strides = array<i32>} : memref<3x8x128xf32, #tpu.memory_space<vmem>>, vector<1x8x128xf32>,
    %c0_i32_42 = arith.constant 0 : i32
    %42 = arith.cmpi eq, %arg1, %c0_i32_42 : i32
    %43 = arith.extui %42 : i1 to i32
    %c0_i32_43 = arith.constant 0 : i32
    %44 = arith.cmpi ne, %43, %c0_i32_43 : i32
    scf.if %44 {
      %c0_44 = arith.constant 0 : index
      %c0_45 = arith.constant 0 : index
      %c0_46 = arith.constant 0 : index
      %45 = vector.load %arg12[%c0_44, %c0_45, %c0_46] : memref<3x8x128xf32, #tpu.memory_space<vmem>>, vector<1x8x128xf32>
      %46 = vector.shape_cast %45 : vector<1x8x128xf32> to vector<8x128xf32>
      %47 = vector.shape_cast %46 : vector<8x128xf32> to vector<1x8x128xf32>
      %cst_47 = arith.constant dense<0.000000e+00> : vector<1xf32>
      %48 = vector.multi_reduction <add>, %47, %cst_47 [1, 2] : vector<1x8x128xf32> to vector<1xf32>
      %49 = vector.shape_cast %48 : vector<1xf32> to vector<1x1x1xf32>
      %50 = vector.extract %49[0, 0, 0] : f32 from vector<1x1x1xf32>
      %c1_48 = arith.constant 1 : index
      %c0_49 = arith.constant 0 : index
      %c0_50 = arith.constant 0 : index
      %51 = vector.load %arg12[%c1_48, %c0_49, %c0_50] : memref<3x8x128xf32, #tpu.memory_space<vmem>>, vector<1x8x128xf32>
      %52 = vector.shape_cast %51 : vector<1x8x128xf32> to vector<8x128xf32>
      %53 = vector.shape_cast %52 : vector<8x128xf32> to vector<1x8x128xf32>
      %cst_51 = arith.constant dense<0.000000e+00> : vector<1xf32>
      %54 = vector.multi_reduction <add>, %53, %cst_51 [1, 2] : vector<1x8x128xf32> to vector<1xf32>
      %55 = vector.shape_cast %54 : vector<1xf32> to vector<1x1x1xf32>
      %56 = vector.extract %55[0, 0, 0] : f32 from vector<1x1x1xf32>
      %c2_52 = arith.constant 2 : index
      %c0_53 = arith.constant 0 : index
      %c0_54 = arith.constant 0 : index
      %57 = vector.load %arg12[%c2_52, %c0_53, %c0_54] : memref<3x8x128xf32, #tpu.memory_space<vmem>>, vector<1x8x128xf32>
      %58 = vector.shape_cast %57 : vector<1x8x128xf32> to vector<8x128xf32>
      %59 = vector.shape_cast %58 : vector<8x128xf32> to vector<1x8x128xf32>
      %cst_55 = arith.constant dense<0.000000e+00> : vector<1xf32>
      %60 = vector.multi_reduction <add>, %59, %cst_55 [1, 2] : vector<1x8x128xf32> to vector<1xf32>
      %61 = vector.shape_cast %60 : vector<1xf32> to vector<1x1x1xf32>
      %62 = vector.extract %61[0, 0, 0] : f32 from vector<1x1x1xf32>
      %c0_56 = arith.constant 0 : index
      %c0_57 = arith.constant 0 : index
      %c0_58 = arith.constant 0 : index
      %63 = vector.load %arg2[%c0_56, %c0_57, %c0_58] : memref<2x9x9xf32, #tpu.memory_space<vmem>>, vector<2x9x9xf32>
      %c0_59 = arith.constant 0 : index
      %c0_60 = arith.constant 0 : index
      %c0_61 = arith.constant 0 : index
      %64 = vector.load %arg3[%c0_59, %c0_60, %c0_61] : memref<2x9x9xf32, #tpu.memory_space<vmem>>, vector<2x9x9xf32>
      %65 = vector.extract_strided_slice %63 {offsets = [0, 0, 0], sizes = [2, 9, 8], strides = [1, 1, 1]} : vector<2x9x9xf32> to vector<2x9x8xf32>
      %66 = vector.extract_strided_slice %63 {offsets = [0, 0, 1], sizes = [2, 9, 8], strides = [1, 1, 1]} : vector<2x9x9xf32> to vector<2x9x8xf32>
      %67 = arith.subf %65, %66 : vector<2x9x8xf32>
      %68 = vector.extract_strided_slice %64 {offsets = [0, 0, 0], sizes = [2, 9, 8], strides = [1, 1, 1]} : vector<2x9x9xf32> to vector<2x9x8xf32>
      %69 = vector.extract_strided_slice %64 {offsets = [0, 0, 1], sizes = [2, 9, 8], strides = [1, 1, 1]} : vector<2x9x9xf32> to vector<2x9x8xf32>
      %70 = arith.subf %68, %69 : vector<2x9x8xf32>
      %71 = vector.extract_strided_slice %67 {offsets = [0, 0, 0], sizes = [2, 9, 7], strides = [1, 1, 1]} : vector<2x9x8xf32> to vector<2x9x7xf32>
      %72 = vector.extract_strided_slice %67 {offsets = [0, 0, 1], sizes = [2, 9, 7], strides = [1, 1, 1]} : vector<2x9x8xf32> to vector<2x9x7xf32>
      %73 = arith.mulf %71, %72 : vector<2x9x7xf32>
      %74 = vector.extract_strided_slice %70 {offsets = [0, 0, 0], sizes = [2, 9, 7], strides = [1, 1, 1]} : vector<2x9x8xf32> to vector<2x9x7xf32>
      %75 = vector.extract_strided_slice %70 {offsets = [0, 0, 1], sizes = [2, 9, 7], strides = [1, 1, 1]} : vector<2x9x8xf32> to vector<2x9x7xf32>
      %76 = arith.mulf %74, %75 : vector<2x9x7xf32>
      %77 = arith.addf %73, %76 : vector<2x9x7xf32>
      %78 = vector.extract_strided_slice %67 {offsets = [0, 0, 0], sizes = [2, 9, 7], strides = [1, 1, 1]} : vector<2x9x8xf32> to vector<2x9x7xf32>
      %79 = arith.mulf %78, %78 : vector<2x9x7xf32>
      %80 = vector.extract_strided_slice %70 {offsets = [0, 0, 0], sizes = [2, 9, 7], strides = [1, 1, 1]} : vector<2x9x8xf32> to vector<2x9x7xf32>
      %81 = arith.mulf %80, %80 : vector<2x9x7xf32>
      %82 = arith.addf %79, %81 : vector<2x9x7xf32>
      %83 = vector.extract_strided_slice %67 {offsets = [0, 0, 1], sizes = [2, 9, 7], strides = [1, 1, 1]} : vector<2x9x8xf32> to vector<2x9x7xf32>
      %84 = arith.mulf %83, %83 : vector<2x9x7xf32>
      %85 = vector.extract_strided_slice %70 {offsets = [0, 0, 1], sizes = [2, 9, 7], strides = [1, 1, 1]} : vector<2x9x8xf32> to vector<2x9x7xf32>
      %86 = arith.mulf %85, %85 : vector<2x9x7xf32>
      %87 = arith.addf %84, %86 : vector<2x9x7xf32>
      %88 = arith.mulf %82, %87 : vector<2x9x7xf32>
      %89 = math.rsqrt %88 : vector<2x9x7xf32>
      %90 = arith.mulf %77, %89 : vector<2x9x7xf32>
      %91 = vector.extract_strided_slice %63 {offsets = [0, 0, 0], sizes = [2, 8, 9], strides = [1, 1, 1]} : vector<2x9x9xf32> to vector<2x8x9xf32>
      %92 = vector.extract_strided_slice %63 {offsets = [0, 1, 0], sizes = [2, 8, 9], strides = [1, 1, 1]} : vector<2x9x9xf32> to vector<2x8x9xf32>
      %93 = arith.subf %91, %92 : vector<2x8x9xf32>
      %94 = vector.extract_strided_slice %64 {offsets = [0, 0, 0], sizes = [2, 8, 9], strides = [1, 1, 1]} : vector<2x9x9xf32> to vector<2x8x9xf32>
      %95 = vector.extract_strided_slice %64 {offsets = [0, 1, 0], sizes = [2, 8, 9], strides = [1, 1, 1]} : vector<2x9x9xf32> to vector<2x8x9xf32>
      %96 = arith.subf %94, %95 : vector<2x8x9xf32>
      %97 = vector.extract_strided_slice %93 {offsets = [0, 0, 0], sizes = [2, 7, 9], strides = [1, 1, 1]} : vector<2x8x9xf32> to vector<2x7x9xf32>
      %98 = vector.extract_strided_slice %93 {offsets = [0, 1, 0], sizes = [2, 7, 9], strides = [1, 1, 1]} : vector<2x8x9xf32> to vector<2x7x9xf32>
      %99 = arith.mulf %97, %98 : vector<2x7x9xf32>
      %100 = vector.extract_strided_slice %96 {offsets = [0, 0, 0], sizes = [2, 7, 9], strides = [1, 1, 1]} : vector<2x8x9xf32> to vector<2x7x9xf32>
      %101 = vector.extract_strided_slice %96 {offsets = [0, 1, 0], sizes = [2, 7, 9], strides = [1, 1, 1]} : vector<2x8x9xf32> to vector<2x7x9xf32>
      %102 = arith.mulf %100, %101 : vector<2x7x9xf32>
      %103 = arith.addf %99, %102 : vector<2x7x9xf32>
      %104 = vector.extract_strided_slice %93 {offsets = [0, 0, 0], sizes = [2, 7, 9], strides = [1, 1, 1]} : vector<2x8x9xf32> to vector<2x7x9xf32>
      %105 = arith.mulf %104, %104 : vector<2x7x9xf32>
      %106 = vector.extract_strided_slice %96 {offsets = [0, 0, 0], sizes = [2, 7, 9], strides = [1, 1, 1]} : vector<2x8x9xf32> to vector<2x7x9xf32>
      %107 = arith.mulf %106, %106 : vector<2x7x9xf32>
      %108 = arith.addf %105, %107 : vector<2x7x9xf32>
      %109 = vector.extract_strided_slice %93 {offsets = [0, 1, 0], sizes = [2, 7, 9], strides = [1, 1, 1]} : vector<2x8x9xf32> to vector<2x7x9xf32>
      %110 = arith.mulf %109, %109 : vector<2x7x9xf32>
      %111 = vector.extract_strided_slice %96 {offsets = [0, 1, 0], sizes = [2, 7, 9], strides = [1, 1, 1]} : vector<2x8x9xf32> to vector<2x7x9xf32>
      %112 = arith.mulf %111, %111 : vector<2x7x9xf32>
      %113 = arith.addf %110, %112 : vector<2x7x9xf32>
      %114 = arith.mulf %108, %113 : vector<2x7x9xf32>
      %115 = math.rsqrt %114 : vector<2x7x9xf32>
      %116 = arith.mulf %103, %115 : vector<2x7x9xf32>
      %cst_62 = arith.constant 1.000000e+00 : f32
      %117 = vector.broadcast %cst_62 : f32 to vector<2x9x7xf32>
      %118 = arith.subf %117, %90 : vector<2x9x7xf32>
      %119 = vector.shape_cast %118 : vector<2x9x7xf32> to vector<1x2x9x7xf32>
      %cst_63 = arith.constant dense<0.000000e+00> : vector<1xf32>
      %120 = vector.multi_reduction <add>, %119, %cst_63 [1, 2, 3] : vector<1x2x9x7xf32> to vector<1xf32>
      %121 = vector.shape_cast %120 : vector<1xf32> to vector<1x1x1x1xf32>
      %122 = vector.extract %121[0, 0, 0, 0] : f32 from vector<1x1x1x1xf32>
      %cst_64 = arith.constant 1.260000e+02 : f32
      %123 = arith.divf %122, %cst_64 : f32
      %cst_65 = arith.constant 1.000000e+00 : f32
      %124 = vector.broadcast %cst_65 : f32 to vector<2x7x9xf32>
      %125 = arith.subf %124, %116 : vector<2x7x9xf32>
      %126 = vector.shape_cast %125 : vector<2x7x9xf32> to vector<1x2x7x9xf32>
      %cst_66 = arith.constant dense<0.000000e+00> : vector<1xf32>
      %127 = vector.multi_reduction <add>, %126, %cst_66 [1, 2, 3] : vector<1x2x7x9xf32> to vector<1xf32>
      %128 = vector.shape_cast %127 : vector<1xf32> to vector<1x1x1x1xf32>
      %129 = vector.extract %128[0, 0, 0, 0] : f32 from vector<1x1x1x1xf32>
      %cst_67 = arith.constant 1.260000e+02 : f32
      %130 = arith.divf %129, %cst_67 : f32
      %131 = arith.addf %123, %130 : f32
      %cst_68 = arith.constant 2.000000e+00 : f32
      %132 = vector.broadcast %cst_68 : f32 to vector<2x9x8xf32>
      %133 = arith.addf %67, %132 : vector<2x9x8xf32>
      %cst_69 = arith.constant 0.000000e+00 : f32
      %134 = vector.broadcast %cst_69 : f32 to vector<2x9x8xf32>
      %135 = arith.maximumf %133, %134 : vector<2x9x8xf32>
      %136 = vector.shape_cast %135 : vector<2x9x8xf32> to vector<1x2x9x8xf32>
      %cst_70 = arith.constant dense<0.000000e+00> : vector<1xf32>
      %137 = vector.multi_reduction <add>, %136, %cst_70 [1, 2, 3] : vector<1x2x9x8xf32> to vector<1xf32>
      %138 = vector.shape_cast %137 : vector<1xf32> to vector<1x1x1x1xf32>
      %139 = vector.extract %138[0, 0, 0, 0] : f32 from vector<1x1x1x1xf32>
      %cst_71 = arith.constant 1.440000e+02 : f32
      %140 = arith.divf %139, %cst_71 : f32
      %cst_72 = arith.constant 2.000000e+00 : f32
      %141 = vector.broadcast %cst_72 : f32 to vector<2x8x9xf32>
      %142 = arith.addf %96, %141 : vector<2x8x9xf32>
      %cst_73 = arith.constant 0.000000e+00 : f32
      %143 = vector.broadcast %cst_73 : f32 to vector<2x8x9xf32>
      %144 = arith.maximumf %142, %143 : vector<2x8x9xf32>
      %145 = vector.shape_cast %144 : vector<2x8x9xf32> to vector<1x2x8x9xf32>
      %cst_74 = arith.constant dense<0.000000e+00> : vector<1xf32>
      %146 = vector.multi_reduction <add>, %145, %cst_74 [1, 2, 3] : vector<1x2x8x9xf32> to vector<1xf32>
      %147 = vector.shape_cast %146 : vector<1xf32> to vector<1x1x1x1xf32>
      %148 = vector.extract %147[0, 0, 0, 0] : f32 from vector<1x1x1x1xf32>
      %cst_75 = arith.constant 1.440000e+02 : f32
      %149 = arith.divf %148, %cst_75 : f32
      %150 = arith.addf %140, %149 : f32
      %151 = tpu.iota {dimensions = array<i32: 0>} : vector<8x128xi32>
      %c0_i32_76 = arith.constant 0 : i32
      %152 = vector.broadcast %c0_i32_76 : i32 to vector<8x128xi32>
      %153 = arith.cmpi eq, %151, %152 : vector<8x128xi32>
      %cst_77 = arith.constant 0.000000e+00 : f32
      %154 = vector.broadcast %50 : f32 to vector<8x128xf32>
      %155 = vector.broadcast %cst_77 : f32 to vector<8x128xf32>
      %156 = arith.select %153, %154, %155 : vector<8x128xi1>, vector<8x128xf32>
      %c1_i32 = arith.constant 1 : i32
      %157 = vector.broadcast %c1_i32 : i32 to vector<8x128xi32>
      %158 = arith.cmpi eq, %151, %157 : vector<8x128xi32>
      %cst_78 = arith.constant 0.000000e+00 : f32
      %159 = vector.broadcast %56 : f32 to vector<8x128xf32>
      %160 = vector.broadcast %cst_78 : f32 to vector<8x128xf32>
      %161 = arith.select %158, %159, %160 : vector<8x128xi1>, vector<8x128xf32>
      %162 = arith.addf %156, %161 : vector<8x128xf32>
      %c2_i32 = arith.constant 2 : i32
      %163 = vector.broadcast %c2_i32 : i32 to vector<8x128xi32>
      %164 = arith.cmpi eq, %151, %163 : vector<8x128xi32>
      %cst_79 = arith.constant 0.000000e+00 : f32
      %165 = vector.broadcast %62 : f32 to vector<8x128xf32>
      %166 = vector.broadcast %cst_79 : f32 to vector<8x128xf32>
      %167 = arith.select %164, %165, %166 : vector<8x128xi1>, vector<8x128xf32>
      %168 = arith.addf %162, %167 : vector<8x128xf32>
      %c3_i32 = arith.constant 3 : i32
      %169 = vector.broadcast %c3_i32 : i32 to vector<8x128xi32>
      %170 = arith.cmpi eq, %151, %169 : vector<8x128xi32>
      %171 = arith.mulf %131, %1 : f32
      %cst_80 = arith.constant 0.000000e+00 : f32
      %172 = vector.broadcast %171 : f32 to vector<8x128xf32>
      %173 = vector.broadcast %cst_80 : f32 to vector<8x128xf32>
      %174 = arith.select %170, %172, %173 : vector<8x128xi1>, vector<8x128xf32>
      %175 = arith.addf %168, %174 : vector<8x128xf32>
      %c4_i32 = arith.constant 4 : i32
      %176 = vector.broadcast %c4_i32 : i32 to vector<8x128xi32>
      %177 = arith.cmpi eq, %151, %176 : vector<8x128xi32>
      %178 = arith.mulf %150, %1 : f32
      %cst_81 = arith.constant 0.000000e+00 : f32
      %179 = vector.broadcast %178 : f32 to vector<8x128xf32>
      %180 = vector.broadcast %cst_81 : f32 to vector<8x128xf32>
      %181 = arith.select %177, %179, %180 : vector<8x128xi1>, vector<8x128xf32>
      %182 = arith.addf %175, %181 : vector<8x128xf32>
      %183 = vector.shape_cast %182 : vector<8x128xf32> to vector<1x8x128xf32>
      %c0_82 = arith.constant 0 : index
      %c0_83 = arith.constant 0 : index
      %c0_84 = arith.constant 0 : index
      %184 = vector.load %arg11[%c0_82, %c0_83, %c0_84] : memref<1x8x128xf32, #tpu.memory_space<vmem>>, vector<1x8x128xf32>
      tpu.vector_store %arg11[%c0_82, %c0_83, %c0_84], %183 {strides = array<i32>} : memref<1x8x128xf32, #tpu.memory_space<vmem>>, vector<1x8x128xf32>,
    } else {
    }
    return
  }
  func.func @transform_0(%arg0: i32, %arg1: i32) -> (i32, i32, i32) {
    %c0_i32 = arith.constant 0 : i32
    %c0_i32_0 = arith.constant 0 : i32
    %c0_i32_1 = arith.constant 0 : i32
    %c0_i32_2 = arith.constant 0 : i32
    return %c0_i32, %c0_i32_0, %c0_i32_1 : i32, i32, i32
  }
  func.func @transform_1(%arg0: i32, %arg1: i32) -> (i32, i32, i32) {
    %c0_i32 = arith.constant 0 : i32
    %c0_i32_0 = arith.constant 0 : i32
    %c0_i32_1 = arith.constant 0 : i32
    %c0_i32_2 = arith.constant 0 : i32
    return %c0_i32, %c0_i32_0, %c0_i32_1 : i32, i32, i32
  }
  func.func @transform_2(%arg0: i32, %arg1: i32) -> (i32, i32, i32) {
    %c0_i32 = arith.constant 0 : i32
    %c0_i32_0 = arith.constant 0 : i32
    return %arg0, %arg1, %c0_i32 : i32, i32, i32
  }
  func.func @transform_3(%arg0: i32, %arg1: i32) -> (i32, i32, i32) {
    %c0_i32 = arith.constant 0 : i32
    %c0_i32_0 = arith.constant 0 : i32
    return %arg0, %arg1, %c0_i32 : i32, i32, i32
  }
  func.func @transform_4(%arg0: i32, %arg1: i32) -> (i32, i32, i32) {
    %c0_i32 = arith.constant 0 : i32
    %c0_i32_0 = arith.constant 0 : i32
    return %arg0, %arg1, %c0_i32 : i32, i32, i32
  }
  func.func @transform_5(%arg0: i32, %arg1: i32) -> (i32, i32, i32) {
    %c0_i32 = arith.constant 0 : i32
    %c0_i32_0 = arith.constant 0 : i32
    return %arg0, %arg1, %c0_i32 : i32, i32, i32
  }
  func.func @transform_6(%arg0: i32, %arg1: i32) -> (i32, i32, i32) {
    %c0_i32 = arith.constant 0 : i32
    %c0_i32_0 = arith.constant 0 : i32
    return %arg0, %arg1, %c0_i32 : i32, i32, i32
  }
  func.func @transform_7(%arg0: i32, %arg1: i32) -> (i32, i32, i32) {
    %c0_i32 = arith.constant 0 : i32
    %c0_i32_0 = arith.constant 0 : i32
    return %arg0, %arg1, %c0_i32 : i32, i32, i32
  }
  func.func @transform_8(%arg0: i32, %arg1: i32) -> (i32, i32, i32) {
    %c0_i32 = arith.constant 0 : i32
    %c0_i32_0 = arith.constant 0 : i32
    return %arg0, %arg1, %c0_i32 : i32, i32, i32
  }
  func.func @transform_9(%arg0: i32, %arg1: i32) -> (i32, i32, i32) {
    %c0_i32 = arith.constant 0 : i32
    %c0_i32_0 = arith.constant 0 : i32
    %c0_i32_1 = arith.constant 0 : i32
    return %arg0, %c0_i32, %c0_i32_0 : i32, i32, i32
  }
}

</mosaic_0001>

<bundles_post_ra>
// kernel: homo_mesh_total_loss.1
= control target key start
LH: loop header
LB: loop body
LE: loop exit
PB: predicated region body
PF: predicated region fallthrough
CT: control target
= control target key end

     0   :  { %s1193_s30 = smov 0   ;;  %s1195_s10 = smov 0   ;;  %s1395_s0 = inlined_call_operand.vmem [shape: f32[2,9,9], index: 0, kind: input, shape index: {}]   ;;  %s1396_s1 = inlined_call_operand.vmem [shape: f32[2,9,9], index: 1, kind: input, shape index: {}]   ;;  %s1397_s2 = inlined_call_operand.vmem [shape: f32[2,8,128], index: 2, kind: input, shape index: {}]   ;;  %s1398_s3 = inlined_call_operand.vmem [shape: f32[2,8,128], index: 3, kind: input, shape index: {}]   ;;  %s1399_s4 = inlined_call_operand.vmem [shape: f32[2,8,128], index: 4, kind: input, shape index: {}]   ;;  %s1400_s5 = inlined_call_operand.vmem [shape: f32[2,8,128], index: 5, kind: input, shape index: {}]   ;;  %s1401_s6 = inlined_call_operand.vmem [shape: f32[2,8,128], index: 6, kind: input, shape index: {}]   ;;  %s1402_s7 = inlined_call_operand.vmem [shape: f32[2,8,128], index: 7, kind: input, shape index: {}]   ;;  %s1403_s8 = inlined_call_operand.vmem [shape: f32[2,8,128], index: 8, kind: input, shape index: {}]   ;;  %s1404_s9 = inlined_call_operand.vmem [shape: f32[2,8,128], index: 9, kind: output, shape index: {}]  }
   0x1   :  { %s1197_s11 = smov 0  }
   0x2 LB: > { %s31_s12 = sadd.s32 1, %s1136_s10  ;;  %p1056_p0 = scmp.ge.s32.totalorder %s1140_s11, 1  ;;  %s1140_s11 = sphi %s1197_s11, %s19_s11   ;;  %s1136_s10 = sphi %s1195_s10, %s1406_s10   ;;  %s1132_s30 = sphi %s1193_s30, %s1405_s30  }
   0x3   : > { %p33_p1 = scmp.ge.s32.totalorder %s31_s12, 2  ;;  %p387_p2 = scmp.lt.s32.totalorder %s1140_s11, 3 }
   0x5   : > { %s1408_s12 = smov (%p33_p1, %s31_s12), 0  ;;  %p388_p3 = pnand %p1056_p0, %p387_p2 }
   0x6   : > { %v1216_v0 = vld [vmem:[%s1396_s1] sm:$0xff] (!%p388_p3)  ;;  %s1142_s17 = smov (!%p388_p3), 127   ;;  %v596_v2 = vld [vmem:[%s1396_s1 + $0x8] sm:$0x1] (!%p388_p3)  ;;  %v597_v4 = vld [vmem:[%s1396_s1 + $0x10] sm:$0xff] (!%p388_p3)  ;;  %vm723_vm0 = vcmask (!%p388_p3), 1046528  }
   0x7   : > { %391 = sbr.rel (%p388_p3) target bundleno = 500 (0x1f4), region = 56  ;;  %v1221_v1 = vld [vmem:[%s1395_s0] sm:$0xff] (!%p388_p3)  ;;  %623 = vrot.lane.b32.xlu1 (!%p388_p3), %v1216_v0, %s1142_s17  ;;  %v592_v3 = vld [vmem:[%s1395_s0 + $0x8] sm:$0x1] (!%p388_p3)  ;;  %v593_v5 = vld [vmem:[%s1395_s0 + $0x10] sm:$0xff] (!%p388_p3)  ;;  %v734_v33 = vrot.slane (!%p388_p3), %v1216_v0, 1 }
   0x8   : > { %603 = vrot.lane.b32.xlu0 (!%p388_p3), %v1221_v1, %s1142_s17  ;;  %v598_v6 = vld [vmem:[%s1396_s1 + $0x18] sm:$0x1] (!%p388_p3)  ;;  %v724_v34 = vrot.slane (!%p388_p3), %v1221_v1, 1  ;;  %v735_v35 = vrot.slane (!%p388_p3), %v596_v2, 1  ;;  %v725_v36 = vrot.slane (!%p388_p3), %v592_v3, 1  ;;  %v737_v39 = vrot.slane (!%p388_p3), %v597_v4, 1 }
   0x9   : > { %v594_v7 = vld [vmem:[%s1395_s0 + $0x18] sm:$0x1] (!%p388_p3)  ;;  %v727_v40 = vrot.slane (!%p388_p3), %v593_v5, 1  ;;  %v738_v41 = vrot.slane (!%p388_p3), %v598_v6, 1  ;;  %p466_p4 = scmp.lt.s32.totalorder (!%p388_p3), %s1132_s30, 1  ;;  %vm807_vm1 = vcmask (!%p388_p3), 71680  }
   0xa   : > { %v728_v42 = vrot.slane (!%p388_p3), %v594_v7, 1  ;;  %v736_v44 = vsel (!%p388_p3), %vm723_vm0, %v734_v33, %v735_v35  ;;  %v726_v45 = vsel (!%p388_p3), %vm723_vm0, %v724_v34, %v725_v36  ;;  %vm857_vm2 = vcmask (!%p388_p3), 72704   ;;  %p519_p5 = scmp.eq.s32.totalorder (!%p388_p3), %s1132_s30, 0 }
   0xb   : > { %625 = vrot.lane.b32.xlu1 (!%p388_p3), %v596_v2, %s1142_s17  ;;  %v739_v46 = vsel (!%p388_p3), %vm723_vm0, %v737_v39, %v738_v41  ;;  %v742_v48 = vsub.f32 (!%p388_p3), %v1216_v0, %v736_v44  ;;  %v732_v49 = vsub.f32 (!%p388_p3), %v1221_v1, %v726_v45  ;;  %vm786_vm3 = vcmask (!%p388_p3), 49152  }
   0xc   : > { %605 = vrot.lane.b32.xlu0 (!%p388_p3), %v592_v3, %s1142_s17  ;;  %v729_v47 = vsel (!%p388_p3), %vm723_vm0, %v727_v40, %v728_v42  ;;  %v743_v50 = vsub.f32 (!%p388_p3), %v597_v4, %v739_v46  ;;  %vm784_vm4 = vcmask (!%p388_p3), 56320   ;;  %vm834_vm5 = vcmask (!%p388_p3), 57344  }
   0xd   : > { %v733_v51 = vsub.f32 (!%p388_p3), %v593_v5, %v729_v47  ;;  %v764_v52 = vmul.f32 (!%p388_p3), %v742_v48, %v742_v48  ;;  %v762_v53 = vmul.f32 (!%p388_p3), %v732_v49, %v732_v49  ;;  %v853_v40 = vadd.f32 (!%p388_p3), 2.0, %v742_v48 }
   0xe   : > { %v765_v54 = vmul.f32 %v743_v50, %v743_v50  ;;  %s467_s13 = scalar_select %p466_p4, %s1132_s30, 1  ;;  %v854_v41 = vadd.f32 2.0, %v743_v50  ;;  %vm832_vm6 = vcmask 64512  }
   0xf   : > { %627 = vrot.lane.b32.xlu1 %v597_v4, %s1142_s17  ;;  %v763_v55 = vmul.f32 %v733_v51, %v733_v51  ;;  %v766_v56 = vadd.f32 %v764_v52, %v762_v53  ;;  %v855_v46 = vmax.f32 %v853_v40, 0.0  ;;  %s1378_s21 = scalar_select %p519_p5, 1.0, 0.0 }
  0x10   : > { %607 = vrot.lane.b32.xlu0 %v593_v5, %s1142_s17  ;;  %s1327_s14 = sshll.u32 %s467_s13, 3  ;;  %v856_v47 = vmax.f32 %v854_v41, 0.0 }
  0x11   : > { %v767_v57 = vadd.f32 %v765_v54, %v763_v55  ;;  %v770_v58 = vrot.slane %v766_v56, 1  ;;  %s472_s18 = scalar_lea.vmem %s1397_s2, %s1327_s14  ;;  %s479_s23 = scalar_lea.vmem %s1398_s3, %s1327_s14 }
  0x12   : > { %v528_v62 = vld [vmem:[%s472_s18] sm:$0xff]  ;;  %s514_s26 = scalar_lea.vmem %s1403_s8, %s1327_s14  ;;  %s493_s29 = scalar_lea.vmem %s1400_s5, %s1327_s14  ;;  %v859_v52 = vsel %vm857_vm2, %v856_v47, 0.0 }
  0x13   : > { %629 = vrot.lane.b32.xlu1 %v598_v6, %s1142_s17  ;;  %v771_v59 = vrot.slane %v767_v57, 1  ;;  %v774_v60 = vmul.f32 %v770_v58, %v766_v56  ;;  %s507_s16 = scalar_lea.vmem %s1402_s7, %s1327_s14  ;;  %s486_s20 = scalar_lea.vmem %s1399_s4, %s1327_s14 }
  0x14   : > { %609 = vrot.lane.b32.xlu0 %v594_v7, %s1142_s17  ;;  %v540_v33 = vld [vmem:[%s486_s20] sm:$0xff] }
  0x15   : > { %v775_v61 = vmul.f32 %v771_v59, %v767_v57  ;;  %1106 = vrsqrt.f32 %v774_v60 }
  0x17   : > { %1108 = vrsqrt.f32 %v775_v61 }
  0x79   : > { %v624_v8 = vpop.permute.xlu1 %623 }
  0x7a   : > { %v604_v9 = vpop.permute.xlu0 %603  ;;  %v1252_v10 = vsub.f32 %v1216_v0, %v624_v8  ;;  %v746_v0 = vrot.slane %v732_v49, 1 }
  0x7b   : > { %v1255_v11 = vsub.f32 %v1221_v1, %v604_v9  ;;  %v747_v1 = vrot.slane %v733_v51, 1 }
  0x7c   : > { %v687_v12 = vmul.f32 %v1252_v10, %v1252_v10 }
  0x7d   : > { %643 = vrot.lane.b32.xlu0 %v1255_v11, %s1142_s17  ;;  %v683_v13 = vmul.f32 %v1255_v11, %v1255_v11  ;;  %v626_v14 = vpop.permute.xlu1 %625  ;;  %v751_v8 = vmul.f32 %v747_v1, %v733_v51  ;;  %v858_v51 = vsel %vm857_vm2, %v855_v46, 0.0 }
  0x7e   : > { %v606_v15 = vpop.permute.xlu0 %605  ;;  %v1263_v16 = vsub.f32 %v596_v2, %v626_v14  ;;  %v754_v2 = vrot.slane %v742_v48, 1  ;;  %v860_v53 = vadd.f32 %v859_v52, %v858_v51 }
  0x7f   : > { %v1265_v17 = vsub.f32 %v592_v3, %v606_v15  ;;  %v1267_v18 = vadd.f32 %v687_v12, %v683_v13  ;;  %v755_v3 = vrot.slane %v743_v50, 1  ;;  %v550_v15 = vld [vmem:[%s493_s29] sm:$0xff] }
  0x80   : > { %v688_v19 = vmul.f32 %v1263_v16, %v1263_v16  ;;  %v758_v9 = vmul.f32 %v754_v2, %v742_v48 }
  0x81   : > { %699 = vrot.lane.b32.xlu0 %v1267_v18, %s1142_s17  ;;  %645 = vrot.lane.b32.xlu1 %v1265_v17, %s1142_s17  ;;  %v684_v20 = vmul.f32 %v1265_v17, %v1265_v17  ;;  %v628_v21 = vpop.permute.xlu1 %627  ;;  %v759_v12 = vmul.f32 %v755_v3, %v743_v50 }
  0x82   : > { %v608_v22 = vpop.permute.xlu0 %607  ;;  %v1277_v23 = vsub.f32 %v597_v4, %v628_v21 }
  0x83   : > { %v1279_v24 = vsub.f32 %v593_v5, %v608_v22  ;;  %v1281_v25 = vadd.f32 %v688_v19, %v684_v20  ;;  %v530_v5 = vld [vmem:[%s479_s23] sm:$0xff]  ;;  %v1107_v19 = vpop.eup %1106  ;;  %v761_v22 = vadd.f32 %v759_v12, %v751_v8 }
  0x84   : > { %v689_v26 = vmul.f32 %v1277_v23, %v1277_v23  ;;  %v541_v20 = vld [vmem:[%s507_s16] sm:$0xff] }
  0x85   : > { %701 = vrot.lane.b32.xlu1 %v1281_v25, %s1142_s17  ;;  %v685_v27 = vmul.f32 %v1279_v24, %v1279_v24  ;;  %v630_v28 = vpop.permute.xlu1 %629 }
  0x86   : > { %v610_v29 = vpop.permute.xlu0 %609  ;;  %v1289_v30 = vsub.f32 %v598_v6, %v630_v28  ;;  %v551_v6 = vld [vmem:[%s514_s26] sm:$0xff] }
  0x87   : > { %v1291_v31 = vsub.f32 %v594_v7, %v610_v29  ;;  %v1293_v32 = vadd.f32 %v689_v26, %v685_v27  ;;  %v750_v7 = vmul.f32 %v746_v0, %v732_v49  ;;  %v552_v14 = vmul.f32 %v551_v6, %v528_v62  ;;  %v1109_v26 = vpop.eup %1108 }
  0x88   : > { %v690_v37 = vmul.f32 %v1289_v30, %v1289_v30  ;;  %v542_v29 = vmul.f32 %v541_v20, %v528_v62  ;;  %v779_v35 = vmul.f32 %v1109_v26, %v761_v22  ;;  %v826_v20 = vadd.f32 2.0, %v1279_v24 }
  0x89   : > { %703 = vrot.lane.b32.xlu0 %v1293_v32, %s1142_s17  ;;  %v686_v38 = vmul.f32 %v1291_v31, %v1291_v31  ;;  %v760_v21 = vadd.f32 %v758_v9, %v750_v7  ;;  %v553_v28 = vsub.f32 %v550_v15, %v552_v14  ;;  %v825_v14 = vadd.f32 2.0, %v1265_v17 }
  0x8a   : > { %v806_v39 = vsub.f32 1.0, %v779_v35 }
  0x8b   : > { %v1303_v43 = vadd.f32 %v690_v37, %v686_v38  ;;  %v778_v34 = vmul.f32 %v1107_v19, %v760_v21  ;;  %v554_v36 = vand.u32 2147483647, %v553_v28  ;;  %v543_v37 = vsub.f32 %v540_v33, %v542_v29 }
  0x8c   : > { %v809_v45 = vsel %vm807_vm1, %v806_v39, 0.0  ;;  %v824_v19 = vadd.f32 2.0, %v1255_v11  ;;  %v829_v33 = vmax.f32 %v825_v14, 0.0 }
  0x8d   : > { %663 = vrot.lane.b32.xlu0 %v1252_v10, %s1142_s17  ;;  %705 = vrot.lane.b32.xlu1 %v1303_v43, %s1142_s17  ;;  %v805_v38 = vsub.f32 1.0, %v778_v34  ;;  %v544_v42 = vand.u32 2147483647, %v543_v37  ;;  %v830_v37 = vmax.f32 %v826_v20, 0.0 }
  0x8f   : > { %v808_v44 = vsel %vm807_vm1, %v805_v38, 0.0 }
  0x90   : > { %v810_v49 = vadd.f32 %v809_v45, %v808_v44  ;;  %v837_v44 = vsel %vm832_vm6, %v830_v37, 0.0 }
  0x91   : > { %647 = vrot.lane.b32.xlu0 %v1279_v24, %s1142_s17  ;;  %665 = vrot.lane.b32.xlu1 %v1263_v16, %s1142_s17 }
  0x95   : > { %649 = vrot.lane.b32.xlu0 %v1291_v31, %s1142_s17  ;;  %667 = vrot.lane.b32.xlu1 %v1277_v23, %s1142_s17 }
  0x99   : > { %669 = vrot.lane.b32.xlu1 %v1289_v30, %s1142_s17  ;;  %s500_s17 = scalar_lea.vmem %s1401_s6, %s1327_s14 }
  0x9a   : > { %v531_v63 = vld [vmem:[%s500_s17] sm:$0xff] }
  0x9b   : > { %v532_v4 = vmul.f32 %v531_v63, %v528_v62 }
  0x9d   : > { %v533_v13 = vsub.f32 %v530_v5, %v532_v4 }
  0x9f   : > { %v534_v27 = vand.u32 2147483647, %v533_v13 }
  0xb4   : > { %562 = vadd.xlane.f32.xlu0 %v534_v27 }
  0xb8   : > { %582 = vadd.xlane.f32.xlu0 %v554_v36 }
  0xbd   : > { %572 = vadd.xlane.f32.xlu1 %v544_v42 }
  0xc1   : > { %811 = vadd.xlane.f32.xlu1 %v810_v49 }
  0xc5   : > { %861 = vadd.xlane.f32.xlu1 %v860_v53 }
  0xef   : > { %v644_v54 = vpop.permute.xlu0 %643 }
  0xf0   : > { %v655_v0 = vmul.f32 %v644_v54, %v1255_v11  ;;  %v828_v11 = vmax.f32 %v824_v19, 0.0 }
  0xf2   : > { %v833_v42 = vsel %vm832_vm6, %v828_v11, 0.0 }
  0xf3   : > { %v646_v55 = vpop.permute.xlu1 %645  ;;  %v700_v56 = vpop.permute.xlu0 %699 }
  0xf4   : > { %v711_v50 = vmul.f32 %v700_v56, %v1267_v18  ;;  %v656_v18 = vmul.f32 %v646_v55, %v1265_v17 }
  0xf6   : > { %1110 = vrsqrt.f32 %v711_v50 }
  0xf7   : > { %v702_v48 = vpop.permute.xlu1 %701 }
  0xf8   : > { %v712_v57 = vmul.f32 %v702_v48, %v1281_v25 }
  0xfa   : > { %1112 = vrsqrt.f32 %v712_v57 }
  0xfb   : > { %v704_v58 = vpop.permute.xlu0 %703 }
  0xfc   : > { %v713_v59 = vmul.f32 %v704_v58, %v1293_v32 }
  0xfe   : > { %1114 = vrsqrt.f32 %v713_v59 }
  0xff   : > { %v706_v60 = vpop.permute.xlu1 %705  ;;  %v664_v61 = vpop.permute.xlu0 %663 }
 0x100   : > { %v675_v62 = vmul.f32 %v664_v61, %v1252_v10  ;;  %v714_v63 = vmul.f32 %v706_v60, %v1303_v43  ;;  %v1111_v4 = vpop.eup %1110 }
 0x102   : > { %v679_v3 = vadd.f32 %v675_v62, %v655_v0  ;;  %1116 = vrsqrt.f32 %v714_v63 }
 0x103   : > { %v666_v1 = vpop.permute.xlu1 %665  ;;  %v648_v2 = vpop.permute.xlu0 %647 }
 0x104   : > { %v676_v25 = vmul.f32 %v666_v1, %v1263_v16  ;;  %v1113_v32 = vpop.eup %1112  ;;  %v719_v7 = vmul.f32 %v1111_v4, %v679_v3  ;;  %v657_v10 = vmul.f32 %v648_v2, %v1279_v24 }
 0x106   : > { %v680_v5 = vadd.f32 %v676_v25, %v656_v18  ;;  %v780_v21 = vsub.f32 1.0, %v719_v7 }
 0x107   : > { %v668_v6 = vpop.permute.xlu1 %667  ;;  %v650_v9 = vpop.permute.xlu0 %649 }
 0x108   : > { %v720_v8 = vmul.f32 %v1113_v32, %v680_v5  ;;  %v677_v43 = vmul.f32 %v668_v6, %v1277_v23  ;;  %v1115_v15 = vpop.eup %1114  ;;  %v658_v26 = vmul.f32 %v650_v9, %v1291_v31  ;;  %v827_v23 = vadd.f32 2.0, %v1291_v31 }
 0x109   : > { %v785_v36 = vsel %vm784_vm4, %v780_v21, 0.0 }
 0x10a   : > { %v781_v12 = vsub.f32 1.0, %v720_v8  ;;  %v681_v13 = vadd.f32 %v677_v43, %v657_v10  ;;  %v831_v40 = vmax.f32 %v827_v23, 0.0 }
 0x10b   : > { %v670_v16 = vpop.permute.xlu1 %669 }
 0x10c   : > { %v721_v22 = vmul.f32 %v1115_v15, %v681_v13  ;;  %v678_v27 = vmul.f32 %v670_v16, %v1289_v30  ;;  %v787_v17 = vsel %vm786_vm3, %v781_v12, 0.0  ;;  %v1117_v34 = vpop.eup %1116  ;;  %v835_v30 = vsel %vm834_vm5, %v829_v33, 0.0 }
 0x10d   : > { %v788_v38 = vadd.f32 %v787_v17, %v785_v36  ;;  %v836_v46 = vadd.f32 %v835_v30, %v833_v42  ;;  %v839_v47 = vsel %vm834_vm5, %v831_v40, 0.0 }
 0x10e   : > { %v782_v28 = vsub.f32 1.0, %v721_v22  ;;  %v682_v29 = vadd.f32 %v678_v27, %v658_v26 }
 0x10f   : > { %v838_v49 = vadd.f32 %v837_v44, %v836_v46 }
 0x110   : > { %v722_v35 = vmul.f32 %v1117_v34, %v682_v29  ;;  %v789_v24 = vsel %vm784_vm4, %v782_v28, 0.0 }
 0x111   : > { %v790_v41 = vadd.f32 %v789_v24, %v788_v38  ;;  %v840_v51 = vadd.f32 %v839_v47, %v838_v49  ;;  %v874_v24 = vlaneseq }
 0x112   : > { %v783_v39 = vsub.f32 1.0, %v722_v35 }
 0x113   : > { %v875_v37 = vshrl.u32 %v874_v24, 7 }
 0x114   : > { %v791_v31 = vsel %vm786_vm3, %v783_v39, 0.0 }
 0x115   : > { %v792_v45 = vadd.f32 %v791_v31, %v790_v41  ;;  %vm876_vm7 = vcmp.eq.s32.totalorder %v875_v37, 0  ;;  %vm879_vm8 = vcmp.eq.s32.totalorder %v875_v37, 1  ;;  %vm883_vm9 = vcmp.eq.s32.totalorder %v875_v37, 2 }
 0x116   : > { %vm887_vm10 = vcmp.eq.s32.totalorder %v875_v37, 3  ;;  %vm892_vm11 = vcmp.eq.s32.totalorder %v875_v37, 4 }
 0x117   : > { %793 = vadd.xlane.f32.xlu0 %v792_v45 }
 0x11b   : > { %841 = vadd.xlane.f32.xlu0 %v840_v51 }
 0x141   : > { %v563_v52 = vpop.xlane.xlu0 %562 }
 0x142   : > { %v564_v53 = vrot.slane %v563_v52, 4 }
 0x144   : > { %v565_v54 = vadd.f32 %v564_v53, %v563_v52 }
 0x145   : > { %v583_v55 = vpop.xlane.xlu0 %582 }
 0x146   : > { %v566_v56 = vrot.slane %v565_v54, 2  ;;  %v584_v48 = vrot.slane %v583_v55, 4 }
 0x148   : > { %v585_v50 = vadd.f32 %v584_v48, %v583_v55  ;;  %v567_v57 = vadd.f32 %v566_v56, %v565_v54 }
 0x14a   : > { %v573_v58 = vpop.xlane.xlu1 %572  ;;  %v586_v59 = vrot.slane %v585_v50, 2  ;;  %v568_v60 = vrot.slane %v567_v57, 1 }
 0x14b   : > { %v574_v61 = vrot.slane %v573_v58, 4 }
 0x14c   : > { %v569_v62 = vadd.f32 %v568_v60, %v567_v57  ;;  %v587_v63 = vadd.f32 %v586_v59, %v585_v50 }
 0x14d   : > { %v575_v0 = vadd.f32 %v574_v61, %v573_v58 }
 0x14e   : > { %1067 = vpush %v569_v62  ;;  %v588_v2 = vrot.slane %v587_v63, 1  ;;  %v812_v5 = vpop.xlane.xlu1 %811 }
 0x14f   : > { %v576_v1 = vrot.slane %v575_v0, 2  ;;  %v813_v32 = vrot.slane %v812_v5, 4 }
 0x150   : > { %v589_v25 = vadd.f32 %v588_v2, %v587_v63 }
 0x151   : > { %v577_v18 = vadd.f32 %v576_v1, %v575_v0  ;;  %v814_v7 = vadd.f32 %v813_v32, %v812_v5 }
 0x152   : > { %v862_v6 = vpop.xlane.xlu1 %861 }
 0x153   : > { %v578_v3 = vrot.slane %v577_v18, 1  ;;  %v863_v8 = vrot.slane %v862_v6, 4  ;;  %v815_v10 = vrot.slane %v814_v7, 2 }
 0x155   : > { %v579_v4 = vadd.f32 %v578_v3, %v577_v18  ;;  %v864_v43 = vadd.f32 %v863_v8, %v862_v6  ;;  %v816_v19 = vadd.f32 %v815_v10, %v814_v7 }
 0x157   : > { %1069 = vpush %v579_v4  ;;  %v865_v14 = vrot.slane %v864_v43, 2  ;;  %v817_v27 = vrot.slane %v816_v19, 1 }
 0x158   : > { %1071 = vpush %v589_v25 }
 0x159   : > { %v866_v26 = vadd.f32 %v865_v14, %v864_v43  ;;  %v818_v33 = vadd.f32 %v817_v27, %v816_v19 }
 0x15b   : > { %v867_v34 = vrot.slane %v866_v26, 1 }
 0x15d   : > { %v868_v36 = vadd.f32 %v867_v34, %v866_v26 }
 0x17f   : > { %s1068_s17 = spop %1067 }
 0x180   : > { %v877_v38 = vstv %s1068_s17 }
 0x181   : > { %v878_v40 = vsel %vm876_vm7, %v877_v38, 0.0 }
 0x188   : > { %s1070_s22 = spop %1069 }
 0x189   : > { %s1072_s23 = spop %1071  ;;  %v880_v39 = vstv %s1070_s22  ;;  %s518_s22 = scalar_lea.vmem %s1404_s9, %s1327_s14 }
 0x18a   : > { %v881_v30 = vsel %vm879_vm8, %v880_v39, 0.0  ;;  %v884_v41 = vstv %s1072_s23 }
 0x18b   : > { %v882_v31 = vadd.f32 %v881_v30, %v878_v40  ;;  %v885_v42 = vsel %vm883_vm9, %v884_v41, 0.0 }
 0x18d   : > { %v886_v46 = vadd.f32 %v885_v42, %v882_v31 }
 0x1a4   : > { %v794_v9 = vpop.xlane.xlu0 %793 }
 0x1a5   : > { %v795_v12 = vrot.slane %v794_v9, 4 }
 0x1a7   : > { %v796_v13 = vadd.f32 %v795_v12, %v794_v9 }
 0x1a8   : > { %v842_v15 = vpop.xlane.xlu0 %841 }
 0x1a9   : > { %v797_v16 = vrot.slane %v796_v13, 2  ;;  %v843_v20 = vrot.slane %v842_v15, 4 }
 0x1ab   : > { %v844_v21 = vadd.f32 %v843_v20, %v842_v15  ;;  %v798_v22 = vadd.f32 %v797_v16, %v796_v13 }
 0x1ad   : > { %v845_v23 = vrot.slane %v844_v21, 2  ;;  %v799_v28 = vrot.slane %v798_v22, 1 }
 0x1af   : > { %v846_v29 = vadd.f32 %v845_v23, %v844_v21  ;;  %v800_v17 = vadd.f32 %v799_v28, %v798_v22 }
 0x1b1   : > { %1073 = vpush %v800_v17  ;;  %v847_v11 = vrot.slane %v846_v29, 1 }
 0x1b2   : > { %1075 = vpush %v818_v33 }
 0x1b3   : > { %v848_v35 = vadd.f32 %v847_v11, %v846_v29 }
 0x1b5   : > { %1077 = vpush %v848_v35 }
 0x1b6   : > { %1079 = vpush %v868_v36 }
 0x1e2   : > { %s1074_s24 = spop %1073 }
 0x1e3   : > { %s804_s25 = smul.f32 0.007936508, %s1074_s24  ;;  %s1076_s26 = spop %1075 }
 0x1e4   : > { %s822_s27 = smul.f32 0.007936508, %s1076_s26 }
 0x1e6   : > { %s823_s28 = sadd.f32 %s822_s27, %s804_s25  ;;  %s1078_s30 = spop %1077 }
 0x1e7   : > { %s852_s29 = smul.f32 0.0069444445, %s1078_s30  ;;  %s1080_s13 = spop %1079 }
 0x1e8   : > { %s888_s15 = smul.f32 %s823_s28, %s1378_s21 }
 0x1e9   : > { %s872_s16 = smul.f32 0.0069444445, %s1080_s13 }
 0x1ea   : > { %v889_v44 = vstv %s888_s15 }
 0x1eb   : > { %s873_s18 = sadd.f32 %s872_s16, %s852_s29  ;;  %v890_v45 = vsel %vm887_vm10, %v889_v44, 0.0 }
 0x1ec   : > { %v891_v47 = vadd.f32 %v890_v45, %v886_v46 }
 0x1ed   : > { %s893_s19 = smul.f32 %s873_s18, %s1378_s21 }
 0x1ef   : > { %v894_v49 = vstv %s893_s19 }
 0x1f0   : > { %v895_v51 = vsel %vm892_vm11, %v894_v49, 0.0 }
 0x1f1   : > { %v896_v52 = vadd.f32 %v895_v51, %v891_v47 }
 0x1f3   : > { %897 = vst [vmem:[%s518_s22] sm:$0xff] %v896_v52 }
 0x1f4 PF: > { %s19_s11 = sadd.s32 1, %s1140_s11   ;;  %s1405_s30 = smov %s1136_s10 }
 0x1f5   : > { %p16_p6 = scmp.ge.s32.totalorder %s19_s11, 4   ;;  %s1406_s10 = smov %s1408_s12 }
 0x1f7   :  { %18 = sbr.rel (!%p16_p6) target bundleno = 2 (0x2), region = 114 }

</bundles_post_ra>
